<compile_context>
chip_gen: v6e
topology: v6e:2x2x1
jax: 0.10.0
libtpu: 0.0.40
codegen_flags: <defaults>
</compile_context>

<pallas_src>
import functools

import jax
import jax.numpy as jnp
from jax.experimental import pallas as pl
from jax.experimental.pallas import tpu as pltpu


def _round_up(x, m):
    return ((x + m - 1) // m) * m


def _int_pow(base, e):
    """base ** e for a positive integer e via square-and-multiply (pure VPU)."""
    result = None
    acc = base
    while e:
        if e & 1:
            result = acc if result is None else result * acc
        e >>= 1
        if e:
            acc = acc * acc
    return result


def _pow_p(p, log_p, g):
    """p ** g for compile-time scalar g, reusing log_p == log(p) for fractional g."""
    g = float(g)
    if g == 0.0:
        return jnp.ones_like(p)
    if g.is_integer() and 0 < g <= 16:
        return _int_pow(p, int(g))
    return jnp.exp(g * log_p)  # one EUP exp; log already available from log-softmax


def _pow_base(base, g):
    """base ** g for compile-time scalar g (positive branch, base = 1 - p)."""
    g = float(g)
    if g == 0.0:
        return jnp.ones_like(base)
    if g.is_integer() and 0 < g <= 16:
        return _int_pow(base, int(g))
    # TODO(synk): torch.pow(0, g) == 0 exactly; the clamp returns ~(1e-30)**g.
    return jnp.exp(g * jnp.log(jnp.maximum(base, 1e-30)))


def _asl_single_label_kernel(x_ref, t_ref, out_ref, *, num_valid_rows,
                             block_rows, eps, gamma_pos, gamma_neg,
                             needs_mask, reduce_classes):
    i = pl.program_id(0)

    x = x_ref[...].astype(jnp.float32)           # (R, C) logits
    t = t_ref[...].astype(jnp.int32)             # (R, 1) class ids
    R, C = x.shape

    # log-softmax over classes (lane dim) with a single exp per element.
    m = jnp.max(x, axis=-1, keepdims=True)
    z = x - m
    e = jnp.exp(z)
    s = jnp.sum(e, axis=-1, keepdims=True)
    log_preds = z - jnp.log(s)                   # (R, C)
    p = e * (1.0 / s)                            # exact per-row reciprocal broadcast

    # one-hot targets via lane iota (replaces torch scatter_)
    col = jax.lax.broadcasted_iota(jnp.int32, (R, C), 1)
    is_target = col == t                         # (R, C) bool

    # asymmetric focal weight: base == (1 - p) at the target class, p elsewhere.
    if float(gamma_pos) == 0.0:
        w = jnp.where(is_target, 1.0, _pow_p(p, log_preds, gamma_neg))
    else:
        w = jnp.where(is_target,
                      _pow_base(1.0 - p, gamma_pos),
                      _pow_p(p, log_preds, gamma_neg))
    weighted = log_preds * w

    # label smoothing (targets*(1-eps) + eps/C) folded into a single select
    contrib = jnp.where(is_target, (1.0 - eps) + eps / C, eps / C) * weighted

    if needs_mask:
        # (R, 1) sublane iota; select (not multiply) so garbage OOB tail rows
        # of the last partial tile can never poison the sum.
        row = jax.lax.broadcasted_iota(jnp.int32, (R, 1), 0) + i * block_rows
        contrib = jnp.where(row < num_valid_rows, contrib, 0.0)

    per_class = jnp.sum(contrib, axis=0, keepdims=True)     # (1, C)
    if reduce_classes:
        out_ref[...] = jnp.sum(per_class, axis=1,
                               keepdims=True).reshape(out_ref.shape)
    else:
        out_ref[...] = per_class.reshape(out_ref.shape)


def asl_single_label(inputs, target, *, gamma_pos=0.0, gamma_neg=4.0,
                     eps=0.1, reduction="mean", block_rows=None,
                     target_tile_bytes=4 * 1024 * 1024, reduce_classes=None):
    """ASLSingleLabel forward.

    inputs: (B, C) logits (f32 or bf16 -- streamed as-is, upcast to f32 inside
    the tile, so bf16 inputs halve HBM traffic); target: (B,) int class ids.
    Note: with C < 128 classes each vreg row is only C/128 occupied, so the
    HBM-roofline numbers only apply for C >= 128.
    """
    B, C = inputs.shape
    itemsize = jnp.dtype(inputs.dtype).itemsize
    c_pad = _round_up(C, 128)                    # lane-padded width in VMEM

    if block_rows is None:
        block_rows = (target_tile_bytes // (itemsize * c_pad)) // 8 * 8
    block_rows = max(8, (block_rows // 8) * 8)
    block_rows = min(block_rows, _round_up(B, 8))

    num_tiles = pl.cdiv(B, block_rows)
    needs_mask = (num_tiles * block_rows) != B   # ragged tail, masked in-kernel
    if reduce_classes is None:
        # very-large-C regime: emit per-tile scalars instead of (1, C) partials
        reduce_classes = C >= 2048

    t2d = target.astype(jnp.int32).reshape(B, 1)

    kernel = functools.partial(
        _asl_single_label_kernel,
        num_valid_rows=B, block_rows=block_rows, eps=float(eps),
        gamma_pos=gamma_pos, gamma_neg=gamma_neg, needs_mask=needs_mask,
        reduce_classes=reduce_classes)

    if reduce_classes:
        out_shape = jax.ShapeDtypeStruct((num_tiles, 1, 1), jnp.float32)
        out_spec = pl.BlockSpec((1, 1, 1), lambda i: (i, 0, 0))
    else:
        out_shape = jax.ShapeDtypeStruct((num_tiles, 1, C), jnp.float32)
        out_spec = pl.BlockSpec((1, 1, C), lambda i: (i, 0, 0))

    # Scoped-VMEM budget: two pipeline buffers of the logits tile + headroom
    # for f32 intermediates (v5e's scoped default is only 16 MiB); cap below
    # v7x's 64 MiB per-TC physical VMEM.
    tile_in = block_rows * c_pad * itemsize
    tile_f32 = block_rows * c_pad * 4
    vmem_limit = 2 * tile_in + 4 * tile_f32 + (2 << 20)
    vmem_limit = int(min(max(vmem_limit, 16 << 20), 48 << 20))

    partials = pl.pallas_call(
        kernel,
        out_shape=out_shape,
        grid_spec=pltpu.PrefetchScalarGridSpec(
            num_scalar_prefetch=0,
            grid=(num_tiles,),
            in_specs=[
                pl.BlockSpec((block_rows, C), lambda i: (i, 0)),
                pl.BlockSpec((block_rows, 1), lambda i: (i, 0)),
            ],
            out_specs=out_spec,
        ),
        compiler_params=pltpu.CompilerParams(
            dimension_semantics=("parallel",),   # megacore sharding on v7x
            vmem_limit_bytes=vmem_limit,
        ),
    )(inputs, t2d)

    total = -jnp.sum(partials)
    if reduction == "mean":
        return total / B
    if reduction == "sum":
        return total
    # TODO(synk): reduction='none' (per-sample loss vector) would need a
    # per-row output spec; only 'mean'/'sum' are implemented.
    raise ValueError(f"unsupported reduction: {reduction}")


def _asl_single_label_reference(inputs, target, gamma_pos=0.0, gamma_neg=4.0,
                                eps=0.1):
    x = inputs.astype(jnp.float32)
    C = x.shape[-1]
    log_preds = jax.nn.log_softmax(x, axis=-1)
    targets = jax.nn.one_hot(target, C, dtype=jnp.float32)
    anti = 1.0 - targets
    xs_pos = jnp.exp(log_preds) * targets
    xs_neg = (1.0 - jnp.exp(log_preds)) * anti
    w = jnp.power(1.0 - xs_pos - xs_neg, gamma_pos * targets + gamma_neg * anti)
    weighted = log_preds * w
    smoothed = targets * (1.0 - eps) + eps / C
    loss = -(smoothed * weighted).sum(-1)
    return loss.mean()


if __name__ == "__main__":
    key = jax.random.PRNGKey(0)
    kx, kt = jax.random.split(key)
    B, C = 8, 16  # batch=8, num_classes=16
    x = jax.random.normal(kx, (B, C), dtype=jnp.float32)
    t = jax.random.randint(kt, (B,), 0, C, dtype=jnp.int32)

    out = jax.block_until_ready(asl_single_label(x, t))
    ref = _asl_single_label_reference(x, t)
    assert jnp.allclose(out, ref, rtol=1e-5, atol=1e-5), (out, ref)

    # ragged batch: no wrapper-side pad; the OOB tail rows of the partial tile
    # are masked with a select inside the kernel.
    out2 = jax.block_until_ready(asl_single_label(x[:6], t[:6]))
    ref2 = _asl_single_label_reference(x[:6], t[:6])
    assert jnp.allclose(out2, ref2, rtol=1e-5, atol=1e-5), (out2, ref2)

    # non-zero gamma_pos: exercises the integer-power positive branch
    out3 = jax.block_until_ready(
        asl_single_label(x, t, gamma_pos=1.0, gamma_neg=2.0))
    ref3 = _asl_single_label_reference(x, t, gamma_pos=1.0, gamma_neg=2.0)
    assert jnp.allclose(out3, ref3, rtol=1e-5, atol=1e-5), (out3, ref3)

    # fractional gamma_neg: exercises the exp(g * log_preds) EUP fallback
    out4 = jax.block_until_ready(asl_single_label(x, t, gamma_neg=2.5))
    ref4 = _asl_single_label_reference(x, t, gamma_neg=2.5)
    assert jnp.allclose(out4, ref4, rtol=1e-5, atol=1e-5), (out4, ref4)

    # large-C output layout (per-tile scalar partials), forced at small shapes
    out5 = jax.block_until_ready(asl_single_label(x, t, reduce_classes=True))
    assert jnp.allclose(out5, ref, rtol=1e-5, atol=1e-5), (out5, ref)

    print("KERNEL_OK")
</pallas_src>

<mosaic_0001>
module attributes {stable_mosaic.version = 11 : i64} {
  func.func @_asl_single_label_kernel(%arg0: i32, %arg1: memref<8x16xf32, #tpu.memory_space<vmem>>, %arg2: memref<8x1xi32, #tpu.memory_space<vmem>>, %arg3: memref<1x1x16xf32, #tpu.memory_space<vmem>>) attributes {dimension_semantics = [#tpu.dimension_semantics<parallel>], iteration_bounds = array<i64: 1>, scalar_prefetch = 0 : i64, scratch_operands = 0 : i64, tpu.core_type = #tpu.core_type<tc>, window_params = [{transform_indices = @transform_0, window_bounds = array<i64: 8, 16>}, {transform_indices = @transform_1, window_bounds = array<i64: 8, 1>}, {transform_indices = @transform_2, window_bounds = array<i64: 1, 1, 16>}]} {
    %c0 = arith.constant 0 : index
    %c0_0 = arith.constant 0 : index
    %0 = vector.load %arg1[%c0, %c0_0] : memref<8x16xf32, #tpu.memory_space<vmem>>, vector<8x16xf32>
    %c0_1 = arith.constant 0 : index
    %c0_2 = arith.constant 0 : index
    %1 = vector.load %arg2[%c0_1, %c0_2] : memref<8x1xi32, #tpu.memory_space<vmem>>, vector<8x1xi32>
    %cst = arith.constant dense<0xFF800000> : vector<8xf32>
    %2 = vector.multi_reduction <maximumf>, %0, %cst [1] : vector<8x16xf32> to vector<8xf32>
    %3 = vector.shape_cast %2 : vector<8xf32> to vector<8x1xf32>
    %4 = vector.broadcast %3 : vector<8x1xf32> to vector<8x16xf32>
    %5 = arith.subf %0, %4 : vector<8x16xf32>
    %6 = math.exp %5 : vector<8x16xf32>
    %cst_3 = arith.constant dense<0.000000e+00> : vector<8xf32>
    %7 = vector.multi_reduction <add>, %6, %cst_3 [1] : vector<8x16xf32> to vector<8xf32>
    %8 = vector.shape_cast %7 : vector<8xf32> to vector<8x1xf32>
    %9 = math.log %8 : vector<8x1xf32>
    %10 = vector.broadcast %9 : vector<8x1xf32> to vector<8x16xf32>
    %11 = arith.subf %5, %10 : vector<8x16xf32>
    %cst_4 = arith.constant 1.000000e+00 : f32
    %12 = vector.broadcast %cst_4 : f32 to vector<8x1xf32>
    %13 = arith.divf %12, %8 : vector<8x1xf32>
    %14 = vector.broadcast %13 : vector<8x1xf32> to vector<8x16xf32>
    %15 = arith.mulf %6, %14 : vector<8x16xf32>
    %16 = tpu.iota {dimensions = array<i32: 1>} : vector<8x16xi32>
    %17 = vector.broadcast %1 : vector<8x1xi32> to vector<8x16xi32>
    %18 = arith.cmpi eq, %16, %17 : vector<8x16xi32>
    %19 = arith.mulf %15, %15 : vector<8x16xf32>
    %20 = arith.mulf %19, %19 : vector<8x16xf32>
    %cst_5 = arith.constant 1.000000e+00 : f32
    %21 = vector.broadcast %cst_5 : f32 to vector<8x16xf32>
    %22 = arith.select %18, %21, %20 : vector<8x16xi1>, vector<8x16xf32>
    %23 = arith.mulf %11, %22 : vector<8x16xf32>
    %cst_6 = arith.constant 9.062500e-01 : f32
    %cst_7 = arith.constant 6.250000e-03 : f32
    %24 = vector.broadcast %cst_6 : f32 to vector<8x16xf32>
    %25 = vector.broadcast %cst_7 : f32 to vector<8x16xf32>
    %26 = arith.select %18, %24, %25 : vector<8x16xi1>, vector<8x16xf32>
    %27 = arith.mulf %26, %23 : vector<8x16xf32>
    %cst_8 = arith.constant dense<0.000000e+00> : vector<16xf32>
    %28 = vector.multi_reduction <add>, %27, %cst_8 [0] : vector<8x16xf32> to vector<16xf32>
    %29 = vector.shape_cast %28 : vector<16xf32> to vector<1x16xf32>
    %30 = vector.shape_cast %29 : vector<1x16xf32> to vector<1x1x16xf32>
    %c0_9 = arith.constant 0 : index
    %c0_10 = arith.constant 0 : index
    %c0_11 = arith.constant 0 : index
    %31 = vector.load %arg3[%c0_9, %c0_10, %c0_11] : memref<1x1x16xf32, #tpu.memory_space<vmem>>, vector<1x1x16xf32>
    tpu.vector_store %arg3[%c0_9, %c0_10, %c0_11], %30 {strides = array<i32>} : memref<1x1x16xf32, #tpu.memory_space<vmem>>, vector<1x1x16xf32>,
    return
  }
  func.func @transform_0(%arg0: i32) -> (i32, i32) {
    %c0_i32 = arith.constant 0 : i32
    %c0_i32_0 = arith.constant 0 : i32
    return %arg0, %c0_i32 : i32, i32
  }
  func.func @transform_1(%arg0: i32) -> (i32, i32) {
    %c0_i32 = arith.constant 0 : i32
    %c0_i32_0 = arith.constant 0 : i32
    return %arg0, %c0_i32 : i32, i32
  }
  func.func @transform_2(%arg0: i32) -> (i32, i32, i32) {
    %c0_i32 = arith.constant 0 : i32
    %c0_i32_0 = arith.constant 0 : i32
    %c0_i32_1 = arith.constant 0 : i32
    return %arg0, %c0_i32, %c0_i32_0 : i32, i32, i32
  }
}

</mosaic_0001>

<bundles_post_ra>
// kernel: tpu_custom_call.1
= control target key start
LH: loop header
LB: loop body
LE: loop exit
PB: predicated region body
PF: predicated region fallthrough
CT: control target
= control target key end

     0   :  { %vm14_vm0 = vcmask 130048   ;;  %s128_s0 = inlined_call_operand.vmem [shape: f32[8,16], index: 0, kind: input, shape index: {}]   ;;  %s129_s1 = inlined_call_operand.vmem [shape: s32[8,1], index: 1, kind: input, shape index: {}]   ;;  %s130_s2 = inlined_call_operand.hbm [shape: f32[1,1,16], index: 2, kind: output, shape index: {}]  }
   0x1   :  { %v12_v0 = vld [vmem:[%s128_s0] sm:$0xff] }
   0x2   :  { %7 = vsyncpa [#allocation3], 0  ;;  %v15_v1 = vsel %vm14_vm0, %v12_v0, -inf  ;;  %v13_v2 = vld [vmem:[%s129_s1] sm:$0xff]  ;;  %v98_v3 = vmov 0   ;;  %v30_v10 = vlaneseq  ;;  %s100_s0 = smov [#allocation2]  }
   0x3   :  { %16 = vmax.xlane.f32.xlu0 %v15_v1  ;;  %68 = vset.pattern.permute.xlu1 %v98_v3  ;;  %v99_v22 = vmov 0.00625   ;;  %s57_s1 = sshll.u32 %s100_s0, 4  ;;  %vm49_vm2 = vcmask 122880   ;;  %s58_s1 = int_to_ptr.vmem [resolvable:$true] %s57_s1 }
   0x4   :  { %69 = vset.pattern.permute.xlu0 %v98_v3  ;;  %33 = vperm.xlu1 %68, %v13_v2   ;;  %v31_v13 = vand.u32 127, %v30_v10  ;;  %s76_s13 = scalar_lea.vmem %s58_s1, 16  ;;  %s80_s14 = scalar_lea.vmem %s58_s1, 32 }
   0x5   :  { %p77_p0 = scmp.ne.s32.totalorder %s58_s1, %s76_s13  ;;  %p81_p1 = scmp.lt.s32.totalorder %s58_s1, %s58_s1 }
   0x6   :  { %p82_p2 = scmp.lt.s32.totalorder %s80_s14, %s76_s13 }
   0x8   :  { %p83_p3 = por %p82_p2, %p81_p1 }
   0xa   :  { %p84_p4 = pnand %p83_p3, %p77_p0 }
  0x7f   :  { %v34_v14 = vpop.permute.xlu1 %33 }
  0x80   :  { %vm35_vm1 = vcmp.eq.s32.totalorder %v31_v13, %v34_v14 }
  0x81   :  { %v40_v23 = vsel %vm35_vm1, 0.90625, %v99_v22 }
  0x8c   :  { %v17_v4 = vpop.xlane.xlu0 %16 }
  0x8d   :  { %v18_v5 = vsub.f32 %v12_v0, %v17_v4 }
  0x8f   :  { %v19_v6 = vmul.f32 1.442695, %v18_v5 }
  0x91   :  { %70 = vpow2.f32 %v19_v6 }
  0x9e   :  { %v71_v7 = vpop.eup %70 }
  0x9f   :  { %v21_v8 = vsel %vm14_vm0, %v71_v7, 0.0 }
  0xa0   :  { %22 = vadd.xlane.f32.xlu0 %v21_v8 }
 0x129   :  { %v23_v9 = vpop.xlane.xlu0 %22 }
 0x12a   :  { %72 = vlog2.f32 %v23_v9 }
 0x12b   :  { %74 = vrcp.f32 %v23_v9 }
 0x137   :  { %v73_v11 = vpop.eup %72 }
 0x138   :  { %v75_v12 = vpop.eup %74  ;;  %v25_v16 = vmul.f32 0.6931472, %v73_v11 }
 0x139   :  { %v29_v15 = vmul.f32 %v75_v12, %v71_v7 }
 0x13a   :  { %v26_v19 = vsub.f32 %v18_v5, %v25_v16 }
 0x13b   :  { %v36_v17 = vmul.f32 %v29_v15, %v29_v15 }
 0x13d   :  { %v37_v18 = vmul.f32 %v36_v17, %v36_v17 }
 0x13f   :  { %v38_v20 = vsel %vm35_vm1, 1.0, %v37_v18 }
 0x140   :  { %v39_v21 = vmul.f32 %v38_v20, %v26_v19 }
 0x142   :  { %v41_v24 = vmul.f32 %v40_v23, %v39_v21 }
 0x144   :  { %v42_v25 = vsel %vm14_vm0, %v41_v24, 0.0 }
 0x145   :  { %v43_v26 = vrot.slane %v42_v25, 4 }
 0x147   :  { %v44_v27 = vadd.f32 %v43_v26, %v42_v25 }
 0x149   :  { %v45_v28 = vrot.slane %v44_v27, 2 }
 0x14b   :  { %v46_v29 = vadd.f32 %v45_v28, %v44_v27 }
 0x14d   :  { %v47_v30 = vrot.slane %v46_v29, 1 }
 0x14f   :  { %v48_v31 = vadd.f32 %v47_v30, %v46_v29 }
 0x151   :  { %50 = vst.msk [vmem:[#allocation2] sm:$0x1] %vm49_vm2, %v48_v31 }
 0x152   :  { %87 = shalt.err (!%p84_p4)
}
 0x153   :  { %60 = dma.vmem_to_hbm [thread:$0]  %s58_s1, 16, %s130_s2, [#allocation3]  }
 0x154   :  { %96 = dma.done.wait [#allocation3], 16  }
 0x155   :  { %97 = vsyncadd [#allocation3], 4294967280 }
 0x156   :  { %64 = vsyncpa [#allocation3], 1 }

</bundles_post_ra>
